<compile_context>
chip_gen: v6e
topology: v6e:2x2x1
jax: 0.10.0
libtpu: 0.0.40
codegen_flags: <defaults>
</compile_context>

<pallas_src>
import functools

import jax
import jax.numpy as jnp
from jax import lax
from jax.experimental import pallas as pl
from jax.experimental.pallas import tpu as pltpu


LANE = 128
SUBLANE = 8


def _round_up(x, m):
    return (x + m - 1) // m * m


# --------------------------------------------------------------------------
# Single fused kernel: im2col conv matmul + bias + ReLU + GAP + folded head.
# --------------------------------------------------------------------------
def _fused_cnn_kernel(hw, n1_valid,
                      x_ref, wc_ref, bc_ref, w1_ref, b1_ref,
                      w2_ref, b2_ref, w3_ref, b3_ref, o_ref):
    # x_ref : (1, Bt*H*W, Kp)   bf16 im2col activations (lane-dense K)
    # wc_ref: (Kp, Cmid)        bf16 conv weight (tap-major rows)
    # bc_ref: (1, Cmid)         f32
    # w1_ref: (Cmid, N1p)       bf16 folded (w_proj @ w1)
    # b1_ref: (1, N1p)          f32  folded (b_proj @ w1 + b1)
    # w2_ref: (N1p, N2p)        bf16
    # b2_ref: (1, N2p)          f32
    # w3_ref: (N2p, N3p)        bf16
    # b3_ref: (1, N3p)          f32
    # o_ref : (1, Bt, N3p)      f32
    bt = o_ref.shape[1]

    # 3x3 conv as ONE K=128 MXU matmul (f32 accumulation), fused bias + ReLU.
    y = jnp.dot(x_ref[0], wc_ref[...], preferred_element_type=jnp.float32)
    y = jnp.maximum(y + bc_ref[...], 0.0)                  # (Bt*HW, Cmid) f32

    # Global average pool per image (rows are image-major).
    pooled = jnp.mean(y.reshape(bt, hw, -1), axis=1)       # (Bt, Cmid) f32

    # Head: Linear(1000,500) with w_proj folded in -> Softmax -> Linear(500,32)
    # -> ReLU -> Linear(32, output_size).  Softmax / elementwise stay f32.
    h1 = jnp.dot(pooled.astype(jnp.bfloat16), w1_ref[...],
                 preferred_element_type=jnp.float32) + b1_ref[...]
    cols = lax.broadcasted_iota(jnp.int32, h1.shape, 1)
    h1 = jnp.where(cols < n1_valid, h1, -1e30)             # mask lane padding
    h1 = h1 - jnp.max(h1, axis=-1, keepdims=True)
    e = jnp.exp(h1)
    denom = jnp.sum(e, axis=-1, keepdims=True)
    s = e * pl.reciprocal(denom, approx=True)              # Softmax(dim=1)

    h2 = jnp.dot(s.astype(jnp.bfloat16), w2_ref[...],
                 preferred_element_type=jnp.float32) + b2_ref[...]
    h2 = jnp.maximum(h2, 0.0)                              # ReLU

    out = jnp.dot(h2.astype(jnp.bfloat16), w3_ref[...],
                  preferred_element_type=jnp.float32) + b3_ref[...]
    o_ref[...] = out.reshape(1, bt, -1).astype(o_ref.dtype)


# --------------------------------------------------------------------------
# Model wrapper
# --------------------------------------------------------------------------
class PallasCNN:
    """Forward-pass equivalent of models/cnn.py::CNN (inference only)."""

    def __init__(self, output_size, *, key, in_channels=3, conv_channels=128,
                 feature_dim=1000, hidden1=500, hidden2=32):
        self.output_size = output_size
        self.in_channels = in_channels
        self.conv_channels = conv_channels
        self.feature_dim = feature_dim
        self.hidden1 = hidden1
        self.hidden2 = hidden2

        ks = jax.random.split(key, 10)

        def init(k, shape, fan_in):
            return jax.random.normal(k, shape, jnp.float32) / jnp.sqrt(fan_in)

        # Stand-in backbone parameters (kept in f32 for the reference).
        self.w_conv = init(ks[0], (3, 3, in_channels, conv_channels),
                           9 * in_channels)
        self.b_conv = init(ks[1], (conv_channels,), conv_channels)
        self.w_proj = init(ks[2], (conv_channels, feature_dim), conv_channels)
        self.b_proj = init(ks[3], (feature_dim,), feature_dim)
        # Head parameters (nn.Linear, stored row-major as (in, out)).
        self.w1 = init(ks[4], (feature_dim, hidden1), feature_dim)
        self.b1 = init(ks[5], (hidden1,), hidden1)
        self.w2 = init(ks[6], (hidden1, hidden2), hidden1)
        self.b2 = init(ks[7], (hidden2,), hidden2)
        self.w3 = init(ks[8], (hidden2, output_size), hidden2)
        self.b3 = init(ks[9], (output_size,), output_size)

        # ---- Pre-packed kernel operands (padded, bf16 MXU operands) ----
        cmid = conv_channels
        self._k_pad = _round_up(9 * in_channels, LANE)          # 27 -> 128
        self._n1_pad = _round_up(hidden1, LANE)                 # 500 -> 512
        self._n2_pad = _round_up(hidden2, LANE)                 # 32  -> 128
        self._n3_pad = _round_up(output_size, LANE)             # out -> 128

        wc = self.w_conv.reshape(9 * in_channels, cmid)
        self._wc = jnp.pad(
            wc, ((0, self._k_pad - 9 * in_channels), (0, 0))
        ).astype(jnp.bfloat16)
        self._bc = self.b_conv.reshape(1, cmid).astype(jnp.float32)

        # Fold the GAP->feature projection into the first head Linear
        # (no nonlinearity between them), done once in f32.
        w1f = self.w_proj @ self.w1                               # (cmid, 500)
        b1f = self.b_proj @ self.w1 + self.b1                     # (500,)
        self._w1 = jnp.pad(
            w1f, ((0, 0), (0, self._n1_pad - hidden1))).astype(jnp.bfloat16)
        self._b1 = jnp.pad(b1f, (0, self._n1_pad - hidden1)
                           ).reshape(1, self._n1_pad).astype(jnp.float32)
        self._w2 = jnp.pad(
            self.w2, ((0, self._n1_pad - hidden1),
                      (0, self._n2_pad - hidden2))).astype(jnp.bfloat16)
        self._b2 = jnp.pad(self.b2, (0, self._n2_pad - hidden2)
                           ).reshape(1, self._n2_pad).astype(jnp.float32)
        self._w3 = jnp.pad(
            self.w3, ((0, self._n2_pad - hidden2),
                      (0, self._n3_pad - output_size))).astype(jnp.bfloat16)
        self._b3 = jnp.pad(self.b3, (0, self._n3_pad - output_size)
                           ).reshape(1, self._n3_pad).astype(jnp.float32)

    # ---------------- im2col (tiny, built in the wrapper) ----------------
    def _im2col(self, x_nchw):
        B, C, H, W = x_nchw.shape
        x = jnp.transpose(x_nchw, (0, 2, 3, 1)).astype(jnp.float32)  # NHWC
        xp = jnp.pad(x, ((0, 0), (1, 1), (1, 1), (0, 0)))
        taps = [xp[:, dy:dy + H, dx:dx + W, :]
                for dy in range(3) for dx in range(3)]
        col = jnp.concatenate(taps, axis=-1)                # (B, H, W, 9*C)
        col = col.reshape(B, H * W, 9 * C)
        col = jnp.pad(col, ((0, 0), (0, 0), (0, self._k_pad - 9 * C)))
        return col                                           # (B, HW, Kp) f32

    # ---------------- fused forward ----------------
    def __call__(self, x_nchw):
        B, C, H, W = x_nchw.shape
        assert C == self.in_channels
        hw = H * W
        cmid = self.conv_channels

        # Batch tile: amortize per-grid-step overhead, but keep >=2 grid
        # steps whenever B >= 2 so v7x can split across its 2 TensorCores.
        if B >= 16:
            bt = 8
        elif B >= 2:
            bt = _round_up(B, 2) // 2
        else:
            bt = 1
        g = pl.cdiv(B, bt)
        b_pad = g * bt

        col = self._im2col(x_nchw)                            # (B, HW, Kp)
        col = jnp.pad(col, ((0, b_pad - B), (0, 0), (0, 0)))
        col = col.reshape(g, bt * hw, self._k_pad).astype(jnp.bfloat16)

        kernel = functools.partial(_fused_cnn_kernel, hw, self.hidden1)
        out = pl.pallas_call(
            kernel,
            out_shape=jax.ShapeDtypeStruct((g, bt, self._n3_pad), jnp.float32),
            grid=(g,),
            in_specs=[
                pl.BlockSpec((1, bt * hw, self._k_pad), lambda i: (i, 0, 0)),
                # Constant index_maps: weights stay VMEM-resident, DMA'd once.
                pl.BlockSpec((self._k_pad, cmid), lambda i: (0, 0)),
                pl.BlockSpec((1, cmid), lambda i: (0, 0)),
                pl.BlockSpec((cmid, self._n1_pad), lambda i: (0, 0)),
                pl.BlockSpec((1, self._n1_pad), lambda i: (0, 0)),
                pl.BlockSpec((self._n1_pad, self._n2_pad), lambda i: (0, 0)),
                pl.BlockSpec((1, self._n2_pad), lambda i: (0, 0)),
                pl.BlockSpec((self._n2_pad, self._n3_pad), lambda i: (0, 0)),
                pl.BlockSpec((1, self._n3_pad), lambda i: (0, 0)),
            ],
            out_specs=pl.BlockSpec((1, bt, self._n3_pad), lambda i: (i, 0, 0)),
            compiler_params=pltpu.CompilerParams(
                # Batch blocks are independent -> shards across v7x's 2 TCs.
                dimension_semantics=("parallel",),
            ),
        )(col, self._wc, self._bc, self._w1, self._b1,
          self._w2, self._b2, self._w3, self._b3)

        # Remove batch padding and logits lane padding.
        return out.reshape(b_pad, self._n3_pad)[:B, :self.output_size]


# --------------------------------------------------------------------------
# Pure-JAX f32 reference (unfolded, unpadded) for a correctness sanity check.
# --------------------------------------------------------------------------
def reference_forward(model, x_nchw):
    x = jnp.transpose(x_nchw, (0, 2, 3, 1)).astype(jnp.float32)
    B, H, W, C = x.shape
    xp = jnp.pad(x, ((0, 0), (1, 1), (1, 1), (0, 0)))
    acc = jnp.zeros((B, H, W, model.conv_channels), jnp.float32)
    for dy in range(3):
        for dx in range(3):
            acc = acc + jnp.einsum('bhwc,cf->bhwf',
                                   xp[:, dy:dy + H, dx:dx + W, :],
                                   model.w_conv[dy, dx])
    y = jnp.maximum(acc + model.b_conv, 0.0)
    pooled = jnp.mean(y, axis=(1, 2))
    feats = pooled @ model.w_proj + model.b_proj
    h1 = feats @ model.w1 + model.b1
    s = jax.nn.softmax(h1, axis=1)
    h2 = jnp.maximum(s @ model.w2 + model.b2, 0.0)
    return h2 @ model.w3 + model.b3


if __name__ == "__main__":
    key = jax.random.PRNGKey(0)
    k_param, k_x = jax.random.split(key)

    output_size = 10
    model = PallasCNN(output_size, key=k_param)

    # NCHW input, matching the PyTorch module's expected layout.
    x = jax.random.normal(k_x, (2, 3, 16, 16), jnp.float32)

    fwd = jax.jit(lambda inp: model(inp))
    out = jax.block_until_ready(fwd(x))
    assert out.shape == (2, output_size), out.shape

    ref = jax.block_until_ready(reference_forward(model, x))
    assert jnp.allclose(out, ref, rtol=2e-2, atol=2e-2), (
        f"max abs err = {float(jnp.max(jnp.abs(out - ref)))}")

    print("KERNEL_OK")
</pallas_src>

<mosaic_0001>
module attributes {stable_mosaic.version = 11 : i64} {
  func.func @_fused_cnn_kernel(%arg0: i32, %arg1: memref<1x256x128xbf16, #tpu.memory_space<vmem>>, %arg2: memref<128x128xbf16, #tpu.memory_space<vmem>>, %arg3: memref<1x128xf32, #tpu.memory_space<vmem>>, %arg4: memref<128x512xbf16, #tpu.memory_space<vmem>>, %arg5: memref<1x512xf32, #tpu.memory_space<vmem>>, %arg6: memref<512x128xbf16, #tpu.memory_space<vmem>>, %arg7: memref<1x128xf32, #tpu.memory_space<vmem>>, %arg8: memref<128x128xbf16, #tpu.memory_space<vmem>>, %arg9: memref<1x128xf32, #tpu.memory_space<vmem>>, %arg10: memref<1x1x128xf32, #tpu.memory_space<vmem>>) attributes {dimension_semantics = [#tpu.dimension_semantics<parallel>], iteration_bounds = array<i64: 2>, scalar_prefetch = 0 : i64, scratch_operands = 0 : i64, tpu.core_type = #tpu.core_type<tc>, window_params = [{transform_indices = @transform_0, window_bounds = array<i64: 1, 256, 128>}, {pipeline_mode = #tpu.pipeline_mode<synchronous>, transform_indices = @transform_1, window_bounds = array<i64: 128, 128>}, {pipeline_mode = #tpu.pipeline_mode<synchronous>, transform_indices = @transform_2, window_bounds = array<i64: 1, 128>}, {pipeline_mode = #tpu.pipeline_mode<synchronous>, transform_indices = @transform_3, window_bounds = array<i64: 128, 512>}, {pipeline_mode = #tpu.pipeline_mode<synchronous>, transform_indices = @transform_4, window_bounds = array<i64: 1, 512>}, {pipeline_mode = #tpu.pipeline_mode<synchronous>, transform_indices = @transform_5, window_bounds = array<i64: 512, 128>}, {pipeline_mode = #tpu.pipeline_mode<synchronous>, transform_indices = @transform_6, window_bounds = array<i64: 1, 128>}, {pipeline_mode = #tpu.pipeline_mode<synchronous>, transform_indices = @transform_7, window_bounds = array<i64: 128, 128>}, {pipeline_mode = #tpu.pipeline_mode<synchronous>, transform_indices = @transform_8, window_bounds = array<i64: 1, 128>}, {transform_indices = @transform_9, window_bounds = array<i64: 1, 1, 128>}]} {
    %c0 = arith.constant 0 : index
    %c0_0 = arith.constant 0 : index
    %c0_1 = arith.constant 0 : index
    %0 = vector.load %arg1[%c0, %c0_0, %c0_1] : memref<1x256x128xbf16, #tpu.memory_space<vmem>>, vector<1x256x128xbf16>
    %1 = vector.shape_cast %0 : vector<1x256x128xbf16> to vector<256x128xbf16>
    %c0_2 = arith.constant 0 : index
    %c0_3 = arith.constant 0 : index
    %2 = vector.load %arg2[%c0_2, %c0_3] : memref<128x128xbf16, #tpu.memory_space<vmem>>, vector<128x128xbf16>
    %cst = arith.constant dense<0.000000e+00> : vector<256x128xf32>
    %3 = tpu.matmul %1, %2, %cst {dimension_numbers = #tpu.dot_dimension_numbers<[1], [0], [0], [1], [0, 0, 1, 1], [], []>} : vector<256x128xbf16>, vector<128x128xbf16>, vector<256x128xf32> -> vector<256x128xf32>
    %c0_4 = arith.constant 0 : index
    %c0_5 = arith.constant 0 : index
    %4 = vector.load %arg3[%c0_4, %c0_5] : memref<1x128xf32, #tpu.memory_space<vmem>>, vector<1x128xf32>
    %5 = vector.broadcast %4 : vector<1x128xf32> to vector<256x128xf32>
    %6 = arith.addf %3, %5 : vector<256x128xf32>
    %cst_6 = arith.constant 0.000000e+00 : f32
    %7 = vector.broadcast %cst_6 : f32 to vector<256x128xf32>
    %8 = arith.maximumf %6, %7 : vector<256x128xf32>
    %9 = vector.shape_cast %8 : vector<256x128xf32> to vector<1x256x128xf32>
    %cst_7 = arith.constant dense<0.000000e+00> : vector<1x128xf32>
    %10 = vector.multi_reduction <add>, %9, %cst_7 [1] : vector<1x256x128xf32> to vector<1x128xf32>
    %cst_8 = arith.constant 2.560000e+02 : f32
    %11 = vector.broadcast %cst_8 : f32 to vector<1x128xf32>
    %12 = arith.divf %10, %11 : vector<1x128xf32>
    %13 = arith.truncf %12 : vector<1x128xf32> to vector<1x128xbf16>
    %c0_9 = arith.constant 0 : index
    %c0_10 = arith.constant 0 : index
    %14 = vector.load %arg4[%c0_9, %c0_10] : memref<128x512xbf16, #tpu.memory_space<vmem>>, vector<128x512xbf16>
    %cst_11 = arith.constant dense<0.000000e+00> : vector<1x512xf32>
    %15 = tpu.matmul %13, %14, %cst_11 {dimension_numbers = #tpu.dot_dimension_numbers<[1], [0], [0], [1], [0, 0, 1, 1], [], []>} : vector<1x128xbf16>, vector<128x512xbf16>, vector<1x512xf32> -> vector<1x512xf32>
    %c0_12 = arith.constant 0 : index
    %c0_13 = arith.constant 0 : index
    %16 = vector.load %arg5[%c0_12, %c0_13] : memref<1x512xf32, #tpu.memory_space<vmem>>, vector<1x512xf32>
    %17 = arith.addf %15, %16 : vector<1x512xf32>
    %18 = tpu.iota {dimensions = array<i32: 1>} : vector<1x512xi32>
    %c500_i32 = arith.constant 500 : i32
    %19 = vector.broadcast %c500_i32 : i32 to vector<1x512xi32>
    %20 = arith.cmpi slt, %18, %19 : vector<1x512xi32>
    %cst_14 = arith.constant -1.000000e+30 : f32
    %21 = vector.broadcast %cst_14 : f32 to vector<1x512xf32>
    %22 = arith.select %20, %17, %21 : vector<1x512xi1>, vector<1x512xf32>
    %cst_15 = arith.constant dense<0xFF800000> : vector<1xf32>
    %23 = vector.multi_reduction <maximumf>, %22, %cst_15 [1] : vector<1x512xf32> to vector<1xf32>
    %24 = vector.shape_cast %23 : vector<1xf32> to vector<1x1xf32>
    %25 = vector.broadcast %24 : vector<1x1xf32> to vector<1x512xf32>
    %26 = arith.subf %22, %25 : vector<1x512xf32>
    %27 = math.exp %26 : vector<1x512xf32>
    %cst_16 = arith.constant dense<0.000000e+00> : vector<1xf32>
    %28 = vector.multi_reduction <add>, %27, %cst_16 [1] : vector<1x512xf32> to vector<1xf32>
    %29 = vector.shape_cast %28 : vector<1xf32> to vector<1x1xf32>
    %30 = tpu.reciprocal %29 {approx = true} : vector<1x1xf32> -> vector<1x1xf32>
    %31 = vector.broadcast %30 : vector<1x1xf32> to vector<1x512xf32>
    %32 = arith.mulf %27, %31 : vector<1x512xf32>
    %33 = arith.truncf %32 : vector<1x512xf32> to vector<1x512xbf16>
    %c0_17 = arith.constant 0 : index
    %c0_18 = arith.constant 0 : index
    %34 = vector.load %arg6[%c0_17, %c0_18] : memref<512x128xbf16, #tpu.memory_space<vmem>>, vector<512x128xbf16>
    %cst_19 = arith.constant dense<0.000000e+00> : vector<1x128xf32>
    %35 = tpu.matmul %33, %34, %cst_19 {dimension_numbers = #tpu.dot_dimension_numbers<[1], [0], [0], [1], [0, 0, 1, 1], [], []>} : vector<1x512xbf16>, vector<512x128xbf16>, vector<1x128xf32> -> vector<1x128xf32>
    %c0_20 = arith.constant 0 : index
    %c0_21 = arith.constant 0 : index
    %36 = vector.load %arg7[%c0_20, %c0_21] : memref<1x128xf32, #tpu.memory_space<vmem>>, vector<1x128xf32>
    %37 = arith.addf %35, %36 : vector<1x128xf32>
    %cst_22 = arith.constant 0.000000e+00 : f32
    %38 = vector.broadcast %cst_22 : f32 to vector<1x128xf32>
    %39 = arith.maximumf %37, %38 : vector<1x128xf32>
    %40 = arith.truncf %39 : vector<1x128xf32> to vector<1x128xbf16>
    %c0_23 = arith.constant 0 : index
    %c0_24 = arith.constant 0 : index
    %41 = vector.load %arg8[%c0_23, %c0_24] : memref<128x128xbf16, #tpu.memory_space<vmem>>, vector<128x128xbf16>
    %cst_25 = arith.constant dense<0.000000e+00> : vector<1x128xf32>
    %42 = tpu.matmul %40, %41, %cst_25 {dimension_numbers = #tpu.dot_dimension_numbers<[1], [0], [0], [1], [0, 0, 1, 1], [], []>} : vector<1x128xbf16>, vector<128x128xbf16>, vector<1x128xf32> -> vector<1x128xf32>
    %c0_26 = arith.constant 0 : index
    %c0_27 = arith.constant 0 : index
    %43 = vector.load %arg9[%c0_26, %c0_27] : memref<1x128xf32, #tpu.memory_space<vmem>>, vector<1x128xf32>
    %44 = arith.addf %42, %43 : vector<1x128xf32>
    %45 = vector.shape_cast %44 : vector<1x128xf32> to vector<1x1x128xf32>
    %c0_28 = arith.constant 0 : index
    %c0_29 = arith.constant 0 : index
    %c0_30 = arith.constant 0 : index
    %46 = vector.load %arg10[%c0_28, %c0_29, %c0_30] : memref<1x1x128xf32, #tpu.memory_space<vmem>>, vector<1x1x128xf32>
    tpu.vector_store %arg10[%c0_28, %c0_29, %c0_30], %45 {strides = array<i32>} : memref<1x1x128xf32, #tpu.memory_space<vmem>>, vector<1x1x128xf32>,
    return
  }
  func.func @transform_0(%arg0: i32) -> (i32, i32, i32) {
    %c0_i32 = arith.constant 0 : i32
    %c0_i32_0 = arith.constant 0 : i32
    %c0_i32_1 = arith.constant 0 : i32
    return %arg0, %c0_i32, %c0_i32_0 : i32, i32, i32
  }
  func.func @transform_1(%arg0: i32) -> (i32, i32) {
    %c0_i32 = arith.constant 0 : i32
    %c0_i32_0 = arith.constant 0 : i32
    %c0_i32_1 = arith.constant 0 : i32
    return %c0_i32, %c0_i32_0 : i32, i32
  }
  func.func @transform_2(%arg0: i32) -> (i32, i32) {
    %c0_i32 = arith.constant 0 : i32
    %c0_i32_0 = arith.constant 0 : i32
    %c0_i32_1 = arith.constant 0 : i32
    return %c0_i32, %c0_i32_0 : i32, i32
  }
  func.func @transform_3(%arg0: i32) -> (i32, i32) {
    %c0_i32 = arith.constant 0 : i32
    %c0_i32_0 = arith.constant 0 : i32
    %c0_i32_1 = arith.constant 0 : i32
    return %c0_i32, %c0_i32_0 : i32, i32
  }
  func.func @transform_4(%arg0: i32) -> (i32, i32) {
    %c0_i32 = arith.constant 0 : i32
    %c0_i32_0 = arith.constant 0 : i32
    %c0_i32_1 = arith.constant 0 : i32
    return %c0_i32, %c0_i32_0 : i32, i32
  }
  func.func @transform_5(%arg0: i32) -> (i32, i32) {
    %c0_i32 = arith.constant 0 : i32
    %c0_i32_0 = arith.constant 0 : i32
    %c0_i32_1 = arith.constant 0 : i32
    return %c0_i32, %c0_i32_0 : i32, i32
  }
  func.func @transform_6(%arg0: i32) -> (i32, i32) {
    %c0_i32 = arith.constant 0 : i32
    %c0_i32_0 = arith.constant 0 : i32
    %c0_i32_1 = arith.constant 0 : i32
    return %c0_i32, %c0_i32_0 : i32, i32
  }
  func.func @transform_7(%arg0: i32) -> (i32, i32) {
    %c0_i32 = arith.constant 0 : i32
    %c0_i32_0 = arith.constant 0 : i32
    %c0_i32_1 = arith.constant 0 : i32
    return %c0_i32, %c0_i32_0 : i32, i32
  }
  func.func @transform_8(%arg0: i32) -> (i32, i32) {
    %c0_i32 = arith.constant 0 : i32
    %c0_i32_0 = arith.constant 0 : i32
    %c0_i32_1 = arith.constant 0 : i32
    return %c0_i32, %c0_i32_0 : i32, i32
  }
  func.func @transform_9(%arg0: i32) -> (i32, i32, i32) {
    %c0_i32 = arith.constant 0 : i32
    %c0_i32_0 = arith.constant 0 : i32
    %c0_i32_1 = arith.constant 0 : i32
    return %arg0, %c0_i32, %c0_i32_0 : i32, i32, i32
  }
}

</mosaic_0001>

<bundles_post_ra>
// kernel: _lambda_.1
= control target key start
LH: loop header
LB: loop body
LE: loop exit
PB: predicated region body
PF: predicated region fallthrough
CT: control target
= control target key end

     0   :  { %14 = vsyncpa [#allocation3], 0  ;;  %s2574_s0 = inlined_call_operand.vmem [shape: bf16[2,256,128], index: 0, kind: input, shape index: {}]   ;;  %s2575_s1 = inlined_call_operand.vmem [shape: bf16[128,128], index: 1, kind: input, shape index: {}]   ;;  %s2576_s2 = inlined_call_operand.vmem [shape: f32[1,128], index: 2, kind: input, shape index: {}]   ;;  %s2577_s3 = inlined_call_operand.vmem [shape: bf16[128,512], index: 3, kind: input, shape index: {}]   ;;  %s2578_s4 = inlined_call_operand.vmem [shape: f32[1,512], index: 4, kind: input, shape index: {}]   ;;  %s2579_s5 = inlined_call_operand.vmem [shape: bf16[512,128], index: 5, kind: input, shape index: {}]   ;;  %s2580_s6 = inlined_call_operand.vmem [shape: f32[1,128], index: 6, kind: input, shape index: {}]   ;;  %s2581_s7 = inlined_call_operand.vmem [shape: bf16[128,128], index: 7, kind: input, shape index: {}]   ;;  %s2582_s8 = inlined_call_operand.vmem [shape: f32[1,128], index: 8, kind: input, shape index: {}]   ;;  %s2583_s9 = inlined_call_operand.hbm [shape: f32[2,1,128], index: 9, kind: output, shape index: {}]  }
   0x1   :  { %16 = vsyncpa [#allocation3 + $0x1], 0  ;;  %s2157_s30 = smov 0   ;;  %s2159_s10 = smov 0  }
   0x2   :  { %s2161_s11 = smov 0   ;;  %s2163_s12 = smov 0  }
   0x3 LB: > { %s2178_s13 = sadd.s32 4294967295, %s2101_s12   ;;  %s1625_s14 = sadd.s32 4294967294, %s2101_s12   ;;  %s2101_s12 = sphi %s2163_s12, %s2589_s12   ;;  %s2097_s11 = sphi %s2161_s11, %s2588_s11   ;;  %s2093_s10 = sphi %s2159_s10, %s2587_s10   ;;  %s2089_s30 = sphi %s2157_s30, %s2586_s30  }
   0x4   : > { %s2182_s15 = sadd.s32 1, %s2101_s12   ;;  %s223_s16 = sadd.s32 1, %s2097_s11 }
   0x5   : > { %s220_s17 = ssub.s32 %s2101_s12, %s2182_s15  ;;  %p233_p0 = scmp.ne.s32.totalorder %s2097_s11, %s2093_s10 }
   0x6   : > { %p221_p1 = scmp.eq.s32.totalorder %s220_s17, 0  ;;  %p234_p2 = scmp.eq.s32.totalorder %s2178_s13, 1 }
   0x7   : > { %p239_p3 = scmp.ne.s32.totalorder %s2093_s10, %s2089_s30  ;;  %p240_p4 = scmp.eq.s32.totalorder %s1625_s14, 1 }
   0x8   : > { %s2193_s18 = scalar_select %p221_p1, %s2097_s11, %s223_s16  }
   0x9   : > { %p2195_p5 = por %p234_p2, %p233_p0  ;;  %p2199_p6 = por %p240_p4, %p239_p3 }
   0xa   : > { %p1628_p7 = scmp.ge.s32.totalorder %s2101_s12, 1  ;;  %p290_p8 = scmp.lt.s32.totalorder %s2101_s12, 3 }
   0xc   : > { %p291_p9 = pnand %p1628_p7, %p290_p8 }
   0xd   : > { %p325_p10 = scmp.lt.s32.totalorder (!%p291_p9), %s2178_s13, 1  ;;  %s1728_s27 = sshll.u32 (!%p291_p9), %s2178_s13, 4 }
   0xe   : > { %294 = sbr.rel (%p291_p9) target bundleno = 1303 (0x517), region = 56  ;;  %s2533_s21 = scalar_lea.hbm (!%p291_p9), %s2583_s9, %s1728_s27 }
  0x13   : > { %v1919_v0 = vld [vmem:[%s2575_s1 + $0x38] sm:$0xff]   ;;  %v1920_v1 = vld [vmem:[%s2575_s1 + $0x30] sm:$0xff]   ;;  %s326_s25 = scalar_select %p325_p10, %s2178_s13, 1  ;;  %v1921_v2 = vld [vmem:[%s2575_s1 + $0x28] sm:$0xff]   ;;  %v2103_v37 = vmov 0   ;;  %vm1072_vm1 = vcmask 1040384  }
  0x14   : > { %1809 = vmatprep.subr.bf16.mxu0 %v1919_v0  ;;  %v1922_v3 = vld [vmem:[%s2575_s1 + $0x20] sm:$0xff]   ;;  %v1923_v5 = vld [vmem:[%s2575_s1 + $0x18] sm:$0xff]   ;;  %v1924_v6 = vld [vmem:[%s2575_s1 + $0x10] sm:$0xff]   ;;  %1009 = vmatprep.mubr.bf16.mxu1 %v2103_v37  ;;  %vm2105_vm2 = vmmov 0   ;;  %s2106_s13 = smov [#allocation2]  }
  0x15   : > { %1810 = vmatpush3.bf16.msra.mxu0 %v1919_v0  ;;  %s1731_s28 = sshll.u32 %s326_s25, 7  ;;  %v1925_v7 = vld [vmem:[%s2575_s1 + $0x8] sm:$0xff]   ;;  %v1926_v8 = vld [vmem:[%s2575_s1] sm:$0xff]   ;;  %s323_s25 = sand.u32 1, %s2093_s10  }
  0x16   : > { %1811 = vmatprep.subr.bf16.mxu0 %v1920_v1  ;;  %s2219_s16 = scalar_lea.vmem %s2574_s0, %s1731_s28  ;;  %v1943_v24 = vld [vmem:[%s2577_s3 + $0xe4] ss:$16 sps:$4 sm:$0xff]   ;;  %v1945_v25 = vld [vmem:[%s2577_s3 + $0xe0] ss:$16 sps:$4 sm:$0xff]   ;;  %v1969_v41 = vld [vmem:[%s2577_s3 + $0xec] ss:$16 sps:$4 sm:$0xff]  }
  0x17   : > { %v1927_v4 = vld [vmem:[%s2219_s16] sm:$0xff]   ;;  %v1928_v9 = vld [vmem:[%s2219_s16 + $0x8] sm:$0xff]   ;;  %v1929_v10 = vld [vmem:[%s2219_s16 + $0x10] sm:$0xff]   ;;  %977 = vmatprep.subr.bf16.mxu1 %v1943_v24  ;;  %s324_s28 = scalar_lea.vmem [#allocation2], %s323_s25  ;;  %s1558_s22 = scalar_lea.sflag [#allocation3], %s323_s25 }
  0x18   : > { %1825 = vmatprep.mubr.bf16.mxu0 %v1927_v4  ;;  %v1930_v11 = vld [vmem:[%s2219_s16 + $0x18] sm:$0xff]   ;;  %v1931_v12 = vld [vmem:[%s2219_s16 + $0x20] sm:$0xff]   ;;  %v1932_v13 = vld [vmem:[%s2219_s16 + $0x28] sm:$0xff]   ;;  %978 = vmatpush1.bf16.msra.mxu1 %v1945_v25  ;;  %s1570_s29 = sshll.u32 %s324_s28, 4  ;;  %s2045_s24 = sshll.u32 %s2106_s13, 4  ;;  %s2535_s29 = int_to_ptr.vmem [resolvable:$true] %s1570_s29  ;;  %s2046_s24 = int_to_ptr.vmem [resolvable:$false] %s2045_s24 }
  0x19   : > { %1812 = vmatpush3.bf16.msra.mxu0 %v1920_v1  ;;  %v1933_v14 = vld [vmem:[%s2219_s16 + $0x30] sm:$0xff]   ;;  %v1934_v15 = vld [vmem:[%s2219_s16 + $0x38] sm:$0xff]   ;;  %v1935_v16 = vld [vmem:[%s2219_s16 + $0x40] sm:$0xff]   ;;  %s2041_s23 = scalar_lea.vmem %s2535_s29, 16  ;;  %s2047_s26 = scalar_lea.vmem %s2046_s24, 32 }
  0x1a   : > { %1813 = vmatprep.subr.bf16.mxu0 %v1921_v2  ;;  %v1936_v17 = vld [vmem:[%s2219_s16 + $0x48] sm:$0xff]   ;;  %v1937_v18 = vld [vmem:[%s2219_s16 + $0x50] sm:$0xff]   ;;  %v1938_v19 = vld [vmem:[%s2219_s16 + $0x58] sm:$0xff]   ;;  %p2042_p11 = scmp.ne.s32.totalorder %s2535_s29, %s2041_s23  ;;  %p2048_p0 = scmp.lt.s32.totalorder %s2535_s29, %s2046_s24 }
  0x1b   : > { %v1939_v20 = vld [vmem:[%s2219_s16 + $0x60] sm:$0xff]   ;;  %v1940_v21 = vld [vmem:[%s2219_s16 + $0x68] sm:$0xff]   ;;  %v1941_v22 = vld [vmem:[%s2219_s16 + $0x70] sm:$0xff]   ;;  %p2049_p1 = scmp.lt.s32.totalorder %s2047_s26, %s2041_s23 }
  0x1c   : > { %v1942_v23 = vld [vmem:[%s2219_s16 + $0x78] sm:$0xff]   ;;  %v1946_v26 = vld [vmem:[%s2577_s3 + $0xc4] ss:$16 sps:$4 sm:$0xff]   ;;  %v1948_v27 = vld [vmem:[%s2577_s3 + $0xc0] ss:$16 sps:$4 sm:$0xff]   ;;  %p2043_p12 = pnand %p2042_p11, %p2195_p5 }
  0x1d   : > { %1814 = vmatpush3.bf16.msra.mxu0 %v1921_v2  ;;  %979 = vmatprep.subr.bf16.mxu1 %v1946_v26  ;;  %v1949_v28 = vld [vmem:[%s2577_s3 + $0xa4] ss:$16 sps:$4 sm:$0xff]   ;;  %v1951_v29 = vld [vmem:[%s2577_s3 + $0xa0] ss:$16 sps:$4 sm:$0xff]   ;;  %p2050_p2 = por %p2049_p1, %p2048_p0 }
  0x1e   : > { %1815 = vmatprep.subr.bf16.mxu0 %v1922_v3  ;;  %980 = vmatpush1.bf16.msra.mxu1 %v1948_v27  ;;  %v1952_v30 = vld [vmem:[%s2577_s3 + $0x84] ss:$16 sps:$4 sm:$0xff]   ;;  %v1954_v31 = vld [vmem:[%s2577_s3 + $0x80] ss:$16 sps:$4 sm:$0xff]   ;;  %p2044_p13 = pneg %p2043_p12 }
  0x1f   : > { %981 = vmatprep.subr.bf16.mxu1 %v1949_v28  ;;  %v1955_v32 = vld [vmem:[%s2577_s3 + $0x64] ss:$16 sps:$4 sm:$0xff]   ;;  %v1957_v33 = vld [vmem:[%s2577_s3 + $0x60] ss:$16 sps:$4 sm:$0xff]  }
  0x20   : > { %v1958_v34 = vld [vmem:[%s2577_s3 + $0x44] ss:$16 sps:$4 sm:$0xff]   ;;  %v1960_v35 = vld [vmem:[%s2577_s3 + $0x40] ss:$16 sps:$4 sm:$0xff]   ;;  %p2051_p3 = pnand %p2050_p2, %p2044_p13 }
  0x21   : > { %1816 = vmatpush3.bf16.msra.mxu0 %v1922_v3  ;;  %v1961_v36 = vld [vmem:[%s2577_s3 + $0x24] ss:$16 sps:$4 sm:$0xff]   ;;  %v1963_v38 = vld [vmem:[%s2577_s3 + $0x20] ss:$16 sps:$4 sm:$0xff]  }
  0x22   : > { %1817 = vmatprep.subr.bf16.mxu0 %v1923_v5  ;;  %982 = vmatpush1.bf16.msra.mxu1 %v1951_v29  ;;  %v1964_v39 = vld [vmem:[%s2577_s3 + $0x4] ss:$16 sps:$4 sm:$0xff]   ;;  %v1966_v40 = vld [vmem:[%s2577_s3] ss:$16 sps:$4 sm:$0xff]  }
  0x23   : > { %983 = vmatprep.subr.bf16.mxu1 %v1952_v30  ;;  %v2307_v44 = vld [vmem:[%s2576_s2] ss:$0 sm:$0xff] }
  0x25   : > { %1818 = vmatpush3.bf16.msra.mxu0 %v1923_v5 }
  0x26   : > { %1819 = vmatprep.subr.bf16.mxu0 %v1924_v6  ;;  %984 = vmatpush1.bf16.msra.mxu1 %v1954_v31 }
  0x27   : > { %985 = vmatprep.subr.bf16.mxu1 %v1955_v32 }
  0x29   : > { %1820 = vmatpush3.bf16.msra.mxu0 %v1924_v6 }
  0x2a   : > { %1821 = vmatprep.subr.bf16.mxu0 %v1925_v7  ;;  %986 = vmatpush1.bf16.msra.mxu1 %v1957_v33 }
  0x2b   : > { %987 = vmatprep.subr.bf16.mxu1 %v1958_v34 }
  0x2d   : > { %1822 = vmatpush3.bf16.msra.mxu0 %v1925_v7 }
  0x2e   : > { %1823 = vmatprep.subr.bf16.mxu0 %v1926_v8  ;;  %988 = vmatpush1.bf16.msra.mxu1 %v1960_v35 }
  0x2f   : > { %989 = vmatprep.subr.bf16.mxu1 %v1961_v36 }
  0x31   : > { %1824 = vmatpush3.bf16.msra.mxu0 %v1926_v8 }
  0x32   : > { %990 = vmatpush1.bf16.msra.mxu1 %v1963_v38 }
  0x33   : > { %991 = vmatprep.subr.bf16.mxu1 %v1964_v39 }
  0x34   : > { %1826 = vmatmul.mubr.bf16.vlgmr.msra.gmra.mxu0 %v1928_v9 }
  0x35   : > { %1829 = vmatprep.mubr.bf16.mxu0 %v1929_v10 }
  0x36   : > { %992 = vmatpush1.bf16.msra.mxu1 %v1966_v40 }
  0x37   : > { %1018 = vmatprep.subr.bf16.mxu1 %v1969_v41 }
  0x3c   : > { %1830 = vmatmul.mubr.bf16.gmra.mxu0 %v1930_v11 }
  0x3d   : > { %1833 = vmatprep.mubr.bf16.mxu0 %v1931_v12 }
  0x44   : > { %1834 = vmatmul.mubr.bf16.gmra.mxu0 %v1932_v13 }
  0x45   : > { %1837 = vmatprep.mubr.bf16.mxu0 %v1933_v14 }
  0x4c   : > { %1838 = vmatmul.mubr.bf16.gmra.mxu0 %v1934_v15 }
  0x4d   : > { %1841 = vmatprep.mubr.bf16.mxu0 %v1935_v16 }
  0x54   : > { %1842 = vmatmul.mubr.bf16.gmra.mxu0 %v1936_v17 }
  0x55   : > { %1845 = vmatprep.mubr.bf16.mxu0 %v1937_v18 }
  0x5c   : > { %1846 = vmatmul.mubr.bf16.gmra.mxu0 %v1938_v19 }
  0x5d   : > { %1849 = vmatprep.mubr.bf16.mxu0 %v1939_v20 }
  0x64   : > { %1850 = vmatmul.mubr.bf16.gmra.mxu0 %v1940_v21 }
  0x65   : > { %1853 = vmatprep.mubr.bf16.mxu0 %v1941_v22 }
  0x6c   : > { %1854 = vmatmul.mubr.bf16.gmra.mxu0 %v1942_v23 }
  0xf4   : > { %v1827_v42 = vpop.f32.mrf.mxu0 }
  0xf5   : > { %v573_v48 = vadd.f32 %v1827_v42, %v2307_v44 }
  0xf6   : > { %v564_v43 = vpop.f32.mrf.mxu0 }
  0xf7   : > { %v565_v46 = vadd.f32 %v2307_v44, %v564_v43  ;;  %v693_v55 = vmax.f32 %v573_v48, 0.0 }
  0xf8   : > { %v1828_v45 = vpop.f32.mrf.mxu0 }
  0xf9   : > { %v691_v51 = vmax.f32 %v565_v46, 0.0  ;;  %v576_v52 = vadd.f32 %v1828_v45, %v2307_v44 }
  0xfa   : > { %v567_v47 = vpop.f32.mrf.mxu0 }
  0xfb   : > { %v568_v49 = vadd.f32 %v2307_v44, %v567_v47  ;;  %v694_v59 = vmax.f32 %v576_v52, 0.0 }
  0xfc   : > { %v1831_v50 = vpop.f32.mrf.mxu0 }
  0xfd   : > { %v692_v53 = vmax.f32 %v568_v49, 0.0  ;;  %v589_v62 = vadd.f32 %v1831_v50, %v2307_v44 }
  0xfe   : > { %v580_v54 = vpop.f32.mrf.mxu0 }
  0xff   : > { %v723_v56 = vadd.f32 %v692_v53, %v691_v51  ;;  %v581_v57 = vadd.f32 %v2307_v44, %v580_v54  ;;  %v697_v7 = vmax.f32 %v589_v62, 0.0 }
 0x100   : > { %v1832_v58 = vpop.f32.mrf.mxu0 }
 0x101   : > { %v724_v60 = vadd.f32 %v723_v56, %v693_v55  ;;  %v695_v63 = vmax.f32 %v581_v57, 0.0  ;;  %v592_v4 = vadd.f32 %v1832_v58, %v2307_v44 }
 0x102   : > { %v583_v61 = vpop.f32.mrf.mxu0 }
 0x103   : > { %v725_v0 = vadd.f32 %v724_v60, %v694_v59  ;;  %v584_v1 = vadd.f32 %v2307_v44, %v583_v61  ;;  %v698_v11 = vmax.f32 %v592_v4, 0.0 }
 0x104   : > { %v1835_v2 = vpop.f32.mrf.mxu0 }
 0x105   : > { %v726_v3 = vadd.f32 %v725_v0, %v695_v63  ;;  %v696_v5 = vmax.f32 %v584_v1, 0.0  ;;  %v605_v14 = vadd.f32 %v1835_v2, %v2307_v44 }
 0x106   : > { %v596_v6 = vpop.f32.mrf.mxu0 }
 0x107   : > { %v727_v8 = vadd.f32 %v726_v3, %v696_v5  ;;  %v597_v9 = vadd.f32 %v2307_v44, %v596_v6  ;;  %v701_v23 = vmax.f32 %v605_v14, 0.0 }
 0x108   : > { %v1836_v10 = vpop.f32.mrf.mxu0 }
 0x109   : > { %v728_v12 = vadd.f32 %v727_v8, %v697_v7  ;;  %v699_v15 = vmax.f32 %v597_v9, 0.0  ;;  %v608_v20 = vadd.f32 %v1836_v10, %v2307_v44 }
 0x10a   : > { %v599_v13 = vpop.f32.mrf.mxu0 }
 0x10b   : > { %v729_v16 = vadd.f32 %v728_v12, %v698_v11  ;;  %v600_v17 = vadd.f32 %v2307_v44, %v599_v13  ;;  %v702_v27 = vmax.f32 %v608_v20, 0.0 }
 0x10c   : > { %v1839_v18 = vpop.f32.mrf.mxu0 }
 0x10d   : > { %v730_v19 = vadd.f32 %v729_v16, %v699_v15  ;;  %v700_v21 = vmax.f32 %v600_v17, 0.0  ;;  %v621_v30 = vadd.f32 %v1839_v18, %v2307_v44 }
 0x10e   : > { %v612_v22 = vpop.f32.mrf.mxu0 }
 0x10f   : > { %v731_v24 = vadd.f32 %v730_v19, %v700_v21  ;;  %v613_v25 = vadd.f32 %v2307_v44, %v612_v22  ;;  %v705_v40 = vmax.f32 %v621_v30, 0.0 }
 0x110   : > { %v1840_v26 = vpop.f32.mrf.mxu0 }
 0x111   : > { %v732_v28 = vadd.f32 %v731_v24, %v701_v23  ;;  %v703_v31 = vmax.f32 %v613_v25, 0.0  ;;  %v624_v36 = vadd.f32 %v1840_v26, %v2307_v44 }
 0x112   : > { %v615_v29 = vpop.f32.mrf.mxu0 }
 0x113   : > { %v733_v32 = vadd.f32 %v732_v28, %v702_v27  ;;  %v616_v33 = vadd.f32 %v2307_v44, %v615_v29  ;;  %v706_v45 = vmax.f32 %v624_v36, 0.0 }
 0x114   : > { %v1843_v34 = vpop.f32.mrf.mxu0 }
 0x115   : > { %v734_v35 = vadd.f32 %v733_v32, %v703_v31  ;;  %v704_v38 = vmax.f32 %v616_v33, 0.0  ;;  %v637_v48 = vadd.f32 %v1843_v34, %v2307_v44 }
 0x116   : > { %v628_v39 = vpop.f32.mrf.mxu0 }
 0x117   : > { %v735_v41 = vadd.f32 %v734_v35, %v704_v38  ;;  %v629_v42 = vadd.f32 %v2307_v44, %v628_v39  ;;  %v709_v57 = vmax.f32 %v637_v48, 0.0 }
 0x118   : > { %v1844_v43 = vpop.f32.mrf.mxu0 }
 0x119   : > { %v736_v46 = vadd.f32 %v735_v41, %v705_v40  ;;  %v707_v49 = vmax.f32 %v629_v42, 0.0  ;;  %v640_v54 = vadd.f32 %v1844_v43, %v2307_v44 }
 0x11a   : > { %v631_v47 = vpop.f32.mrf.mxu0 }
 0x11b   : > { %v737_v50 = vadd.f32 %v736_v46, %v706_v45  ;;  %v632_v51 = vadd.f32 %v2307_v44, %v631_v47  ;;  %v710_v61 = vmax.f32 %v640_v54, 0.0 }
 0x11c   : > { %v1847_v52 = vpop.f32.mrf.mxu0 }
 0x11d   : > { %v738_v53 = vadd.f32 %v737_v50, %v707_v49  ;;  %v708_v55 = vmax.f32 %v632_v51, 0.0  ;;  %v653_v0 = vadd.f32 %v1847_v52, %v2307_v44 }
 0x11e   : > { %v644_v56 = vpop.f32.mrf.mxu0 }
 0x11f   : > { %v739_v58 = vadd.f32 %v738_v53, %v708_v55  ;;  %v645_v59 = vadd.f32 %v2307_v44, %v644_v56  ;;  %v713_v9 = vmax.f32 %v653_v0, 0.0  ;;  %v1967_v53 = vld [vmem:[%s2577_s3 + $0xe8] ss:$16 sps:$4 sm:$0xff]   ;;  %v1975_v56 = vld [vmem:[%s2577_s3 + $0xac] ss:$16 sps:$4 sm:$0xff]  }
 0x120   : > { %v1848_v60 = vpop.f32.mrf.mxu0  ;;  %v1970_v55 = vld [vmem:[%s2577_s3 + $0xc8] ss:$16 sps:$4 sm:$0xff]  }
 0x121   : > { %v740_v62 = vadd.f32 %v739_v58, %v709_v57  ;;  %v711_v1 = vmax.f32 %v645_v59, 0.0  ;;  %v656_v6 = vadd.f32 %v1848_v60, %v2307_v44  ;;  %v1973_v57 = vld [vmem:[%s2577_s3 + $0xa8] ss:$16 sps:$4 sm:$0xff]   ;;  %v1978_v58 = vld [vmem:[%s2577_s3 + $0x8c] ss:$16 sps:$4 sm:$0xff]  }
 0x122   : > { %v647_v63 = vpop.f32.mrf.mxu0  ;;  %v1981_v59 = vld [vmem:[%s2577_s3 + $0x6c] ss:$16 sps:$4 sm:$0xff]   ;;  %v1979_v60 = vld [vmem:[%s2577_s3 + $0x68] ss:$16 sps:$4 sm:$0xff]  }
 0x123   : > { %v741_v2 = vadd.f32 %v740_v62, %v710_v61  ;;  %v648_v3 = vadd.f32 %v2307_v44, %v647_v63  ;;  %v714_v13 = vmax.f32 %v656_v6, 0.0  ;;  %v1984_v61 = vld [vmem:[%s2577_s3 + $0x4c] ss:$16 sps:$4 sm:$0xff]   ;;  %v1982_v62 = vld [vmem:[%s2577_s3 + $0x48] ss:$16 sps:$4 sm:$0xff]  }
 0x124   : > { %v1851_v4 = vpop.f32.mrf.mxu0  ;;  %v1987_v63 = vld [vmem:[%s2577_s3 + $0x2c] ss:$16 sps:$4 sm:$0xff]   ;;  %v1985_v0 = vld [vmem:[%s2577_s3 + $0x28] ss:$16 sps:$4 sm:$0xff]  }
 0x125   : > { %v742_v5 = vadd.f32 %v741_v2, %v711_v1  ;;  %v712_v7 = vmax.f32 %v648_v3, 0.0  ;;  %v669_v16 = vadd.f32 %v1851_v4, %v2307_v44  ;;  %v1990_v1 = vld [vmem:[%s2577_s3 + $0xc] ss:$16 sps:$4 sm:$0xff]   ;;  %v1988_v2 = vld [vmem:[%s2577_s3 + $0x8] ss:$16 sps:$4 sm:$0xff]  }
 0x126   : > { %v660_v8 = vpop.f32.mrf.mxu0 }
 0x127   : > { %v743_v10 = vadd.f32 %v742_v5, %v712_v7  ;;  %v661_v11 = vadd.f32 %v2307_v44, %v660_v8  ;;  %v717_v25 = vmax.f32 %v669_v16, 0.0  ;;  %v957_v7 = vlaneseq }
 0x128   : > { %v1852_v12 = vpop.f32.mrf.mxu0 }
 0x129   : > { %v744_v14 = vadd.f32 %v743_v10, %v713_v9  ;;  %v715_v17 = vmax.f32 %v661_v11, 0.0  ;;  %v672_v22 = vadd.f32 %v1852_v12, %v2307_v44  ;;  %v958_v8 = vshrl.u32 %v957_v7, 7 }
 0x12a   : > { %v663_v15 = vpop.f32.mrf.mxu0  ;;  %v1060_v12 = vand.u32 127, %v957_v7 }
 0x12b   : > { %v745_v18 = vadd.f32 %v744_v14, %v714_v13  ;;  %v664_v19 = vadd.f32 %v2307_v44, %v663_v15  ;;  %v718_v29 = vmax.f32 %v672_v22, 0.0  ;;  %v963_v9 = vsub.s32 1, %v958_v8  ;;  %v795_v13 = vld [vmem:[%s2578_s4] sm:$0xf] }
 0x12c   : > { %v1855_v20 = vpop.f32.mrf.mxu0  ;;  %v959_v10 = vsub.s32 0, %v958_v8  ;;  %v967_v11 = vsub.s32 2, %v958_v8  ;;  %v971_v14 = vsub.s32 3, %v958_v8 }
 0x12d   : > { %v746_v21 = vadd.f32 %v745_v18, %v715_v17  ;;  %v716_v23 = vmax.f32 %v664_v19, 0.0  ;;  %v685_v32 = vadd.f32 %v1855_v20, %v2307_v44  ;;  %v964_v15 = vrot.slane %v795_v13, %v963_v9 }
 0x12e   : > { %v676_v24 = vpop.f32.mrf.mxu0  ;;  %v960_v16 = vrot.slane %v795_v13, %v959_v10  ;;  %v968_v17 = vrot.slane %v795_v13, %v967_v11  ;;  %v1063_v18 = vadd.s32 384, %v1060_v12  ;;  %v972_v19 = vrot.slane %v795_v13, %v971_v14  ;;  %v2010_v11 = vld [vmem:[%s2579_s5 + $0xa0] sm:$0xff]   ;;  %v2011_v12 = vld [vmem:[%s2579_s5 + $0x48] sm:$0xff]   ;;  %v2013_v14 = vld [vmem:[%s2579_s5 + $0xd8] sm:$0xff]  }
 0x12f   : > { %v747_v26 = vadd.f32 %v746_v21, %v716_v23  ;;  %v677_v27 = vadd.f32 %v2307_v44, %v676_v24  ;;  %v721_v40 = vmax.f32 %v685_v32, 0.0  ;;  %v2012_v13 = vld [vmem:[%s2579_s5 + $0x8] sm:$0xff]  }
 0x130   : > { %v1856_v28 = vpop.f32.mrf.mxu0  ;;  %vm1067_vm0 = vcmp.lt.s32.totalorder %v1063_v18, 500  ;;  %v2018_v18 = vld [vmem:[%s2579_s5] sm:$0xff]  }
 0x131   : > { %v748_v30 = vadd.f32 %v747_v26, %v717_v25  ;;  %v719_v33 = vmax.f32 %v677_v27, 0.0  ;;  %v688_v38 = vadd.f32 %v1856_v28, %v2307_v44 }
 0x132   : > { %v679_v31 = vpop.f32.mrf.mxu0 }
 0x133   : > { %v749_v34 = vadd.f32 %v748_v30, %v718_v29  ;;  %v680_v35 = vadd.f32 %v2307_v44, %v679_v31  ;;  %v722_v42 = vmax.f32 %v688_v38, 0.0  ;;  %v1972_v44 = vld [vmem:[%s2577_s3 + $0xcc] ss:$16 sps:$4 sm:$0xff]  }
 0x134   : > { %v1992_v38 = vld [vmem:[%s2579_s5 + $0x38] sm:$0xff]  }
 0x135   : > { %v750_v36 = vadd.f32 %v749_v34, %v719_v33  ;;  %v720_v39 = vmax.f32 %v680_v35, 0.0 }
 0x137   : > { %v751_v41 = vadd.f32 %v750_v36, %v720_v39  ;;  %v1991_v36 = vld [vmem:[%s2579_s5 + $0x78] sm:$0xff]   ;;  %v1993_v39 = vld [vmem:[%s2579_s5 + $0x70] sm:$0xff]  }
 0x138   : > { %1756 = vmatprep.subr.bf16.mxu0 %v1991_v36  ;;  %v2024_v36 = vld [vmem:[%s2581_s7 + $0x30] sm:$0xff]  }
 0x139   : > { %v752_v43 = vadd.f32 %v751_v41, %v721_v40  ;;  %1757 = vmatpush3.bf16.msra.mxu0 %v1992_v38  ;;  %v1994_v40 = vld [vmem:[%s2579_s5 + $0x30] sm:$0xff]   ;;  %v2001_v41 = vld [vmem:[%s2579_s5 + $0xf8] sm:$0xff]   ;;  %v2025_v38 = vld [vmem:[%s2581_s7 + $0x28] sm:$0xff]  }
 0x13a   : > { %1758 = vmatprep.subr.bf16.mxu0 %v1993_v39  ;;  %v2026_v39 = vld [vmem:[%s2581_s7 + $0x20] sm:$0xff]  }
 0x13b   : > { %v753_v45 = vadd.f32 %v752_v43, %v722_v42  ;;  %v2002_v42 = vld [vmem:[%s2579_s5 + $0xb8] sm:$0xff]   ;;  %v1995_v43 = vld [vmem:[%s2579_s5 + $0x68] sm:$0xff]  }
 0x13d   : > { %v754_v46 = vrot.slane %v753_v45, 4  ;;  %1759 = vmatpush3.bf16.msra.mxu0 %v1994_v40  ;;  %v2027_v40 = vld [vmem:[%s2581_s7 + $0x18] sm:$0xff]  }
 0x13e   : > { %1760 = vmatprep.subr.bf16.mxu0 %v1995_v43  ;;  %v2030_v43 = vld [vmem:[%s2581_s7] sm:$0xff]  }
 0x13f   : > { %v755_v47 = vadd.f32 %v754_v46, %v753_v45  ;;  %v2003_v45 = vld [vmem:[%s2579_s5 + $0xf0] sm:$0xff]  }
 0x140   : > { %v2004_v46 = vld [vmem:[%s2579_s5 + $0xb0] sm:$0xff]  }
 0x141   : > { %v756_v48 = vrot.slane %v755_v47, 2 }
 0x143   : > { %v757_v49 = vadd.f32 %v756_v48, %v755_v47  ;;  %v1996_v47 = vld [vmem:[%s2579_s5 + $0x28] sm:$0xff]  }
 0x144   : > { %v2007_v48 = vld [vmem:[%s2579_s5 + $0xe8] sm:$0xff]   ;;  %1761 = vmatpush3.bf16.msra.mxu0 %v1996_v47  ;;  %v1176_v47 = vld [vmem:[%s2580_s6] sm:$0x1] }
 0x145   : > { %v758_v50 = vrot.slane %v757_v49, 1 }
 0x147   : > { %v759_v51 = vadd.f32 %v758_v50, %v757_v49  ;;  %v1997_v49 = vld [vmem:[%s2579_s5 + $0x60] sm:$0xff]   ;;  %v2008_v50 = vld [vmem:[%s2579_s5 + $0xa8] sm:$0xff]  }
 0x148   : > { %1762 = vmatprep.subr.bf16.mxu0 %v1997_v49 }
 0x149   : > { %v761_v52 = vmul.f32 0.00390625, %v759_v51  ;;  %v1998_v51 = vld [vmem:[%s2579_s5 + $0x20] sm:$0xff]  }
 0x14a   : > { %1763 = vmatpush3.bf16.msra.mxu0 %v1998_v51 }
 0x14b   : > { %v762_v54 = vpack.c.bf16 %v761_v52, %v761_v52  ;;  %v2009_v52 = vld [vmem:[%s2579_s5 + $0xe0] sm:$0xff]  }
 0x14d   : > { %1010 = vmatmul.mubr.bf16.vlgmr.msra.gmra.mxu1 %v762_v54 }
 0x14e   : > { %1019 = vmatpush1.bf16.msra.mxu1 %v1967_v53  ;;  %1050 = vmatprep.mubr.bf16.mxu1 %v2103_v37  ;;  %v1976_v37 = vld [vmem:[%s2577_s3 + $0x88] ss:$16 sps:$4 sm:$0xff]  }
 0x14f   : > { %1020 = vmatprep.subr.bf16.mxu1 %v1972_v44  ;;  %v1999_v53 = vld [vmem:[%s2579_s5 + $0x58] sm:$0xff]   ;;  %v2005_v44 = vld [vmem:[%s2579_s5 + $0x50] sm:$0xff]  }
 0x150   : > { %1764 = vmatprep.subr.bf16.mxu0 %v1999_v53 }
 0x152   : > { %1021 = vmatpush1.bf16.msra.mxu1 %v1970_v55  ;;  %v2006_v55 = vld [vmem:[%s2579_s5 + $0x10] sm:$0xff]  }
 0x153   : > { %1022 = vmatprep.subr.bf16.mxu1 %v1975_v56 }
 0x156   : > { %1023 = vmatpush1.bf16.msra.mxu1 %v1973_v57 }
 0x157   : > { %1024 = vmatprep.subr.bf16.mxu1 %v1978_v58 }
 0x15a   : > { %1025 = vmatpush1.bf16.msra.mxu1 %v1976_v37 }
 0x15b   : > { %1026 = vmatprep.subr.bf16.mxu1 %v1981_v59 }
 0x15e   : > { %1027 = vmatpush1.bf16.msra.mxu1 %v1979_v60 }
 0x15f   : > { %1028 = vmatprep.subr.bf16.mxu1 %v1984_v61 }
 0x162   : > { %1029 = vmatpush1.bf16.msra.mxu1 %v1982_v62 }
 0x163   : > { %1030 = vmatprep.subr.bf16.mxu1 %v1987_v63 }
 0x166   : > { %1031 = vmatpush1.bf16.msra.mxu1 %v1985_v0 }
 0x167   : > { %1032 = vmatprep.subr.bf16.mxu1 %v1990_v1 }
 0x16a   : > { %1033 = vmatpush1.bf16.msra.mxu1 %v1988_v2 }
 0x16b   : > { %1778 = vmatprep.subr.bf16.mxu1 %v2001_v41  ;;  %v2028_v41 = vld [vmem:[%s2581_s7 + $0x10] sm:$0xff]  }
 0x16d   : > { %1051 = vmatmul.mubr.bf16.vlgmr.msra.gmra.mxu1 %v762_v54  ;;  %v2000_v54 = vld [vmem:[%s2579_s5 + $0x18] sm:$0xff]  }
 0x16e   : > { %1779 = vmatpush3.bf16.msra.mxu1 %v2002_v42  ;;  %1765 = vmatpush3.bf16.msra.mxu0 %v2000_v54  ;;  %v2029_v42 = vld [vmem:[%s2581_s7 + $0x8] sm:$0xff]  }
 0x16f   : > { %1780 = vmatprep.subr.bf16.mxu1 %v2003_v45  ;;  %1766 = vmatprep.subr.bf16.mxu0 %v2005_v44 }
 0x172   : > { %1781 = vmatpush3.bf16.msra.mxu1 %v2004_v46  ;;  %1767 = vmatpush3.bf16.msra.mxu0 %v2006_v55 }
 0x173   : > { %1782 = vmatprep.subr.bf16.mxu1 %v2007_v48  ;;  %1768 = vmatprep.subr.bf16.mxu0 %v2011_v12 }
 0x176   : > { %1783 = vmatpush3.bf16.msra.mxu1 %v2008_v50  ;;  %1769 = vmatpush3.bf16.msra.mxu0 %v2012_v13 }
 0x177   : > { %1784 = vmatprep.subr.bf16.mxu1 %v2009_v52 }
 0x17a   : > { %1785 = vmatpush3.bf16.msra.mxu1 %v2010_v11 }
 0x17b   : > { %1786 = vmatprep.subr.bf16.mxu1 %v2013_v14 }
 0x20d   : > { %v1011_v3 = vpop.f32.mrf.mxu1 }
 0x20e   : > { %v1012_v22 = vadd.f32 %v1011_v3, %v960_v16  ;;  %v2017_v16 = vld [vmem:[%s2579_s5 + $0x40] sm:$0xff]  }
 0x20f   : > { %v1013_v4 = vpop.f32.mrf.mxu1  ;;  %1770 = vmatprep.subr.bf16.mxu0 %v2017_v16 }
 0x210   : > { %v2390_v20 = vadd.f32 %v1013_v4, %v964_v15  ;;  %v1073_v29 = vsel %vm1072_vm1, %v1012_v22, -inf  ;;  %v2014_v15 = vld [vmem:[%s2579_s5 + $0x98] sm:$0xff]   ;;  %1771 = vmatpush3.bf16.msra.mxu0 %v2018_v18 }
 0x211   : > { %v1015_v5 = vpop.f32.mrf.mxu1  ;;  %1787 = vmatpush3.bf16.msra.mxu1 %v2014_v15 }
 0x212   : > { %v1074_v26 = vsel %vm1072_vm1, %v2390_v20, -inf }
 0x213   : > { %v1016_v6 = vpop.f32.mrf.mxu1  ;;  %v1077_v33 = vmax.f32 %v1073_v29, %v1074_v26 }
 0x22d   : > { %v1052_v21 = vpop.f32.mrf.mxu1 }
 0x22e   : > { %v1053_v23 = vadd.f32 %v1052_v21, %v968_v17  ;;  %v2015_v17 = vld [vmem:[%s2579_s5 + $0xd0] sm:$0xff]   ;;  %v2020_v21 = vld [vmem:[%s2579_s5 + $0x88] sm:$0xff]  }
 0x22f   : > { %v1054_v24 = vpop.f32.mrf.mxu1  ;;  %1788 = vmatprep.subr.bf16.mxu1 %v2015_v17 }
 0x230   : > { %v1055_v25 = vadd.f32 %v1054_v24, %v972_v19  ;;  %v1075_v30 = vsel %vm1072_vm1, %v1053_v23, -inf  ;;  %v2016_v19 = vld [vmem:[%s2579_s5 + $0x90] sm:$0xff]   ;;  %v2104_v24 = vmov 0.0  }
 0x231   : > { %v1056_v27 = vpop.f32.mrf.mxu1  ;;  %1789 = vmatpush3.bf16.msra.mxu1 %v2016_v19  ;;  %1857 = vmatprep.subr.bf16.mxu0 %v2104_v24 }
 0x232   : > { %v1071_v28 = vsel %vm1067_vm0, %v1055_v25, -1e+30 }
 0x233   : > { %v1057_v31 = vpop.f32.mrf.mxu1  ;;  %v1076_v32 = vsel %vm1072_vm1, %v1071_v28, -inf }
 0x234   : > { %v1078_v34 = vmax.f32 %v1075_v30, %v1076_v32 }
 0x236   : > { %v1079_v35 = vmax.f32 %v1077_v33, %v1078_v34 }
 0x238   : > { %1080 = vmax.xlane.f32.xlu0 %v1079_v35  ;;  %v2023_v35 = vld [vmem:[%s2581_s7 + $0x38] sm:$0xff]  }
 0x2c1   : > { %v1081_v56 = vpop.xlane.xlu0 %1080 }
 0x2c2   : > { %v1082_v57 = vsub.f32 %v1012_v22, %v1081_v56  ;;  %v1083_v58 = vsub.f32 %v2390_v20, %v1081_v56  ;;  %v1084_v37 = vsub.f32 %v1053_v23, %v1081_v56  ;;  %v1085_v59 = vsub.f32 %v1071_v28, %v1081_v56  ;;  %v2019_v20 = vld [vmem:[%s2579_s5 + $0xc8] sm:$0xff]   ;;  %v2021_v22 = vld [vmem:[%s2579_s5 + $0xc0] sm:$0xff]  }
 0x2c3   : > { %1790 = vmatprep.subr.bf16.mxu1 %v2019_v20  ;;  %v2022_v23 = vld [vmem:[%s2579_s5 + $0x80] sm:$0xff]  }
 0x2c4   : > { %v1086_v60 = vmul.f32 1.442695, %v1082_v57  ;;  %v1088_v61 = vmul.f32 1.442695, %v1083_v58  ;;  %v1090_v62 = vmul.f32 1.442695, %v1084_v37  ;;  %1791 = vmatpush3.bf16.msra.mxu1 %v2020_v21 }
 0x2c5   : > { %v1092_v63 = vmul.f32 1.442695, %v1085_v59  ;;  %1792 = vmatprep.subr.bf16.mxu1 %v2021_v22  ;;  %v1467_v37 = vld [vmem:[%s2582_s8] sm:$0x1] }
 0x2c6   : > { %2031 = vpow2.f32 %v1086_v60 }
 0x2c7   : > { %2033 = vpow2.f32 %v1088_v61 }
 0x2c8   : > { %2035 = vpow2.f32 %v1090_v62  ;;  %1793 = vmatpush3.bf16.msra.mxu1 %v2022_v23 }
 0x2c9   : > { %2037 = vpow2.f32 %v1092_v63 }
 0x2d3   : > { %v2032_v0 = vpop.eup %2031 }
 0x2d4   : > { %v2034_v1 = vpop.eup %2033  ;;  %v1094_v2 = vsel %vm1072_vm1, %v2032_v0, 0.0 }
 0x2d5   : > { %v2036_v3 = vpop.eup %2035  ;;  %v1095_v4 = vsel %vm1072_vm1, %v2034_v1, 0.0 }
 0x2d6   : > { %v2038_v5 = vpop.eup %2037  ;;  %v1096_v6 = vadd.f32 %v1095_v4, %v1094_v2  ;;  %v1097_v7 = vsel %vm1072_vm1, %v2036_v3, 0.0 }
 0x2d7   : > { %v1099_v9 = vsel %vm1072_vm1, %v2038_v5, 0.0 }
 0x2d8   : > { %v1098_v8 = vadd.f32 %v1097_v7, %v1096_v6 }
 0x2da   : > { %v1100_v10 = vadd.f32 %v1099_v9, %v1098_v8 }
 0x2dc   : > { %1101 = vadd.xlane.f32.xlu0 %v1100_v10 }
 0x365   : > { %v1102_v25 = vpop.xlane.xlu0 %1101 }
 0x366   : > { %2039 = vrcp.f32 %v1102_v25 }
 0x373   : > { %v2040_v26 = vpop.eup %2039 }
 0x374   : > { %v1105_v27 = vmul.f32 %v2040_v26, %v2034_v1  ;;  %v1107_v28 = vmul.f32 %v2040_v26, %v2038_v5  ;;  %v1104_v29 = vmul.f32 %v2040_v26, %v2032_v0  ;;  %v1106_v30 = vmul.f32 %v2040_v26, %v2036_v3 }
 0x376   : > { %v1109_v31 = vpack.c.bf16 %v1105_v27, %v1105_v27  ;;  %v1111_v32 = vpack.c.bf16 %v1107_v28, %v1107_v28  ;;  %v1108_v33 = vpack.c.bf16 %v1104_v29, %v1104_v29  ;;  %v1110_v34 = vpack.c.bf16 %v1106_v30, %v1106_v30 }
 0x378   : > { %1401 = vmatprep.mubr.bf16.mxu0 %v1109_v31  ;;  %1441 = vmatprep.mubr.bf16.mxu1 %v1111_v32 }
 0x379   : > { %1402 = vmatmul.mubr.bf16.vlgmr.msra.gmra.mxu0 %v1108_v33  ;;  %1442 = vmatmul.mubr.bf16.vlgmr.msra.gmra.mxu1 %v1110_v34 }
 0x37a   : > { %1858 = vmatpush3.bf16.msra.mxu0 %v2023_v35  ;;  %1873 = vmatprep.mubr.msk.bf16.mxu0 %vm2105_vm2, %v2104_v24 }
 0x37b   : > { %1859 = vmatprep.subr.bf16.mxu0 %v2104_v24 }
 0x37e   : > { %1860 = vmatpush3.bf16.msra.mxu0 %v2024_v36 }
 0x37f   : > { %1861 = vmatprep.subr.bf16.mxu0 %v2104_v24 }
 0x382   : > { %1862 = vmatpush3.bf16.msra.mxu0 %v2025_v38 }
 0x383   : > { %1863 = vmatprep.subr.bf16.mxu0 %v2104_v24 }
 0x386   : > { %1864 = vmatpush3.bf16.msra.mxu0 %v2026_v39 }
 0x387   : > { %1865 = vmatprep.subr.bf16.mxu0 %v2104_v24 }
 0x38a   : > { %1866 = vmatpush3.bf16.msra.mxu0 %v2027_v40 }
 0x38b   : > { %1867 = vmatprep.subr.bf16.mxu0 %v2104_v24 }
 0x38e   : > { %1868 = vmatpush3.bf16.msra.mxu0 %v2028_v41 }
 0x38f   : > { %1869 = vmatprep.subr.bf16.mxu0 %v2104_v24 }
 0x392   : > { %1870 = vmatpush3.bf16.msra.mxu0 %v2029_v42 }
 0x393   : > { %1871 = vmatprep.subr.bf16.mxu0 %v2104_v24 }
 0x396   : > { %1872 = vmatpush3.bf16.msra.mxu0 %v2030_v43 }
 0x439   : > { %v1772_v45 = vpop.f32.mrf.mxu0  ;;  %v1794_v46 = vpop.f32.mrf.mxu1 }
 0x43b   : > { %v1773_v48 = vpop.f32.mrf.mxu0  ;;  %v1795_v49 = vpop.f32.mrf.mxu1 }
 0x43c   : > { %v1774_v50 = vadd.f32 %v1773_v48, %v1772_v45  ;;  %v1796_v54 = vadd.f32 %v1795_v49, %v1794_v46 }
 0x43d   : > { %v1775_v51 = vpop.f32.mrf.mxu0  ;;  %v1797_v52 = vpop.f32.mrf.mxu1 }
 0x43e   : > { %v1404_v53 = vadd.f32 %v1774_v50, %v1176_v47 }
 0x43f   : > { %v1776_v44 = vpop.f32.mrf.mxu0  ;;  %v1798_v55 = vpop.f32.mrf.mxu1 }
 0x440   : > { %v1444_v56 = vadd.f32 %v1796_v54, %v1404_v53 }
 0x442   : > { %v1449_v57 = vmax.f32 %v1444_v56, 0.0 }
 0x444   : > { %v1450_v58 = vpack.c.bf16 %v1449_v57, %v1449_v57 }
 0x446   : > { %1874 = vmatmul.mubr.bf16.vlgmr.msra.gmra.mxu0 %v1450_v58 }
 0x506   : > { %v1550_v59 = vpop.f32.mrf.mxu0 }
 0x507   : > { %v1551_v60 = vadd.f32 %v1550_v59, %v1467_v37 }
 0x508   : > { %v1875_v61 = vpop.f32.mrf.mxu0 }
 0x509   : > { %1556 = vst [vmem:[%s324_s28] sm:$0x1] %v1551_v60 }
 0x50a   : > { %v1553_v62 = vpop.f32.mrf.mxu0 }
 0x50b   : > { %2054 = shalt.err (!%p2051_p3)
}
 0x50c   : > { %s2055_s16 = scalar_lea.hbm %s2533_s21, 16  ;;  %s2059_s28 = scalar_lea.hbm %s2583_s9, 32 }
 0x50d   : > { %p2056_p4 = scmp.ne.s32.totalorder %s2533_s21, %s2055_s16  ;;  %p2060_p9 = scmp.lt.s32.totalorder %s2533_s21, %s2583_s9 }
 0x50e   : > { %p2061_p10 = scmp.lt.s32.totalorder %s2059_s28, %s2055_s16 }
 0x50f   : > { %p2057_p7 = pnand %p2056_p4, %p2195_p5 }
 0x510   : > { %p2062_p11 = por %p2061_p10, %p2060_p9 }
 0x511   : > { %p2058_p8 = pneg %p2057_p7 }
 0x513   : > { %p2063_p12 = pnand %p2062_p11, %p2058_p8 }
 0x515   : > { %2066 = shalt.err (!%p2063_p12)
}
 0x516   : > { %1877 = dma.vmem_to_hbm [thread:$0]  (%p2195_p5), %s2535_s29, 16, %s2533_s21, %s1558_s22   ;;  %v1876_v63 = vpop.f32.mrf.mxu0 }
 0x517 PF: > { %p1883_p13 = scmp.ge.s32.totalorder %s2101_s12, 2  ;;  %s1582_s23 = sand.u32 1, %s2089_s30  }
 0x518   : > { %s1583_s13 = scalar_lea.sflag [#allocation3], %s1582_s23 }
 0x519   : > { %p1880_p0 = pnand %p1883_p13, %p2199_p6 }
 0x51b   : > { %p1881_p1 = pneg %p1880_p0 }
 0x51d   : > { %2084 = dma.done.wait (%p1881_p1), %s1583_s13, 16  }
 0x51e   : > { %2086 = vsyncadd (%p1881_p1), %s1583_s13, 4294967280  ;;  %p19_p2 = scmp.ge.s32.totalorder %s2182_s15, 4   ;;  %s2586_s30 = smov %s2093_s10 }
 0x51f   : > { %s2587_s10 = smov %s2097_s11  ;;  %s2588_s11 = smov %s2193_s18 }
 0x520   : > { %s2589_s12 = smov %s2182_s15  ;;  %21 = sbr.rel (!%p19_p2) target bundleno = 3 (0x3), region = 91 }
 0x525   :  { %1587 = vsyncpa [#allocation3], 1 }
 0x526   :  { %1589 = vsyncpa [#allocation3 + $0x1], 1 }

</bundles_post_ra>
